<compile_context>
chip_gen: v7x
topology: tpu7x:2x2x1
jax: 0.10.0
libtpu: 0.0.40
codegen_flags: <defaults>
</compile_context>

<pallas_src>
import jax
import jax.numpy as jnp
from jax.experimental import pallas as pl
from jax.experimental.pallas import tpu as pltpu


def _add_pos_kernel(x_ref, pos_ref, o_ref):
    # out = x + pos; pos (1, tk) broadcasts over the batch-tile sublanes.
    o_ref[...] = (x_ref[...] + pos_ref[...]).astype(o_ref.dtype)


def build_pos_table(max_len: int, num_hiddens: int) -> jnp.ndarray:
    """Reproduce the __init__ buffer P of shape (1, max_len, num_hiddens)."""
    t = jnp.arange(max_len, dtype=jnp.float32)[:, None]                          # (L, 1)
    freq = jnp.power(
        10000.0, jnp.arange(0, num_hiddens, 2, dtype=jnp.float32) / num_hiddens
    )                                                                            # (ceil(H/2),)
    ang = t / freq                                                               # (L, ceil(H/2))
    P = jnp.zeros((max_len, num_hiddens), dtype=jnp.float32)
    P = P.at[:, 0::2].set(jnp.sin(ang))
    P = P.at[:, 1::2].set(jnp.cos(ang)[:, : num_hiddens // 2])
    return P[None]                                                               # (1, L, H)


def _largest_aligned_divisor(n: int, unit: int, cap: int):
    """Largest t with t % unit == 0, n % t == 0 and t <= min(n, cap); None if none."""
    best = None
    hi = min(n, cap)
    t = unit
    while t <= hi:
        if n % t == 0:
            best = t
        t += unit
    return best


def _block_target_bytes() -> int:
    """Per-generation x/out block budget; 4 double-buffers must fit default scoped VMEM."""
    try:
        kind = jax.devices()[0].device_kind.lower()
    except Exception:
        kind = ""
    if "v5e" in kind or ("v5" in kind and "lite" in kind):
        return 3 * 1024 * 1024      # v5e: 16 MiB scoped default -> 4 x 3 MiB = 12 MiB
    if "v6" in kind or "v7" in kind:
        return 7 * 1024 * 1024      # v6e/v7x: 32 MiB scoped default -> 4 x 7 MiB = 28 MiB
    return 4 * 1024 * 1024          # unknown backend: stay conservative


def positional_encoding(x: jnp.ndarray, pos_table: jnp.ndarray,
                        *, donate_x: bool = False) -> jnp.ndarray:
    """x: (B, L, H), pos_table: (1, max_len, H) -> (B, L, H).  Computes x + P[:, :L, :]."""
    B, L, H = x.shape
    assert pos_table.ndim == 3 and pos_table.shape[0] == 1
    assert pos_table.shape[1] >= L and pos_table.shape[2] == H

    K = L * H
    itemsize = jnp.dtype(x.dtype).itemsize

    x2 = x.reshape(B, K)                                        # free contiguous reshape
    # Pre-cast the table once in the wrapper (constant-folds under jit): halves pos DMA
    # bytes for bf16/f16 activations and keeps the kernel body a single same-dtype add.
    pos2 = pos_table[:, :L, :].reshape(1, K).astype(x.dtype)

    # Pad the lane (contiguous) dim to a multiple of 128 -> unmasked lane-dense stores
    # and a guaranteed 128-multiple tile (worst case tk = 128).  Sliced off afterwards.
    K_pad = -(-K // 128) * 128
    if K_pad != K:
        x2 = jnp.pad(x2, ((0, 0), (0, K_pad - K)))
        pos2 = jnp.pad(pos2, ((0, 0), (0, K_pad - K)))

    # Pad the batch (sublane) dim to a multiple of 8 only when it is large; a small B
    # uses the full dim as the block (full-array-dim blocks are always legal).
    B_pad = B
    if B % 8 != 0 and B > 8:
        B_pad = -(-B // 8) * 8
        x2 = jnp.pad(x2, ((0, B_pad - B), (0, 0)))

    target = _block_target_bytes()

    # Lane tile FIRST: longest contiguous 128-multiple divisor the budget allows with the
    # minimum sublane tile -> long HBM bursts, fewest pos tiles.
    tb_min = 8 if B_pad % 8 == 0 else B_pad
    cap_k = max(128, (target // max(1, tb_min * itemsize)) // 128 * 128)
    tk = _largest_aligned_divisor(K_pad, 128, cap_k) or 128

    # Then spend the remaining budget on the sublane (batch) tile.
    if B_pad % 8 == 0:
        cap_b = max(8, (target // max(1, tk * itemsize)) // 8 * 8)
        tb = _largest_aligned_divisor(B_pad, 8, cap_b) or B_pad
    else:
        tb = B_pad

    # v7x megacore: if large blocks collapsed the grid to a single tile on a non-trivial
    # problem, re-split the K axis so both TensorCores issue DMA.
    if (K_pad // tk) * (B_pad // tb) == 1 and B_pad * K_pad * itemsize > (1 << 20):
        if K_pad // 128 >= 2:
            half_cap = max(128, (tk // 2) // 128 * 128)
            half = _largest_aligned_divisor(K_pad, 128, half_cap)
            if half is not None and half < tk:
                tk = half
        elif B_pad % 8 == 0 and B_pad // 8 >= 2:
            tb = _largest_aligned_divisor(B_pad, 8, max(8, tb // 2)) or tb

    grid = (K_pad // tk, B_pad // tb)   # K axis OUTER -> pos tile reused across batch tiles

    out2 = pl.pallas_call(
        _add_pos_kernel,
        out_shape=jax.ShapeDtypeStruct((B_pad, K_pad), x.dtype),
        grid=grid,
        in_specs=[
            pl.BlockSpec((tb, tk), lambda ki, bi: (bi, ki)),    # x tile
            pl.BlockSpec((1, tk), lambda ki, bi: (0, ki)),      # pos tile (shared over batch)
        ],
        out_specs=pl.BlockSpec((tb, tk), lambda ki, bi: (bi, ki)),
        compiler_params=pltpu.CompilerParams(
            dimension_semantics=("parallel", "parallel"),
        ),
        input_output_aliases=({0: 0} if donate_x else {}),
    )(x2, pos2)

    if B_pad != B or K_pad != K:
        out2 = out2[:B, :K]
    return out2.reshape(B, L, H)


if __name__ == "__main__":
    # Small shapes consistent with the module: batch=2, seq=8 (<= max_len=16), hidden=32.
    B, L, H, MAX_LEN = 2, 8, 32, 16

    key = jax.random.PRNGKey(0)
    x = jax.random.normal(key, (B, L, H), dtype=jnp.float32)
    pos_table = build_pos_table(MAX_LEN, H)

    out = jax.block_until_ready(positional_encoding(x, pos_table))

    # Reference check in plain JAX (same math as the PyTorch forward with p=0 dropout).
    ref = x + pos_table[:, :L, :]
    assert out.shape == (B, L, H)
    assert jnp.allclose(out, ref, atol=1e-6, rtol=1e-6)

    print("KERNEL_OK")
</pallas_src>

<mosaic_0001>
module attributes {stable_mosaic.version = 11 : i64} {
  func.func @_add_pos_kernel(%arg0: i32, %arg1: i32, %arg2: memref<2x256xf32, #tpu.memory_space<vmem>>, %arg3: memref<1x256xf32, #tpu.memory_space<vmem>>, %arg4: memref<2x256xf32, #tpu.memory_space<vmem>>) attributes {dimension_semantics = [#tpu.dimension_semantics<parallel>, #tpu.dimension_semantics<parallel>], iteration_bounds = array<i64: 1, 1>, scalar_prefetch = 0 : i64, scratch_operands = 0 : i64, tpu.core_type = #tpu.core_type<tc>, window_params = [{transform_indices = @transform_0, window_bounds = array<i64: 2, 256>}, {transform_indices = @transform_1, window_bounds = array<i64: 1, 256>}, {transform_indices = @transform_2, window_bounds = array<i64: 2, 256>}]} {
    %c0 = arith.constant 0 : index
    %c0_0 = arith.constant 0 : index
    %0 = vector.load %arg2[%c0, %c0_0] : memref<2x256xf32, #tpu.memory_space<vmem>>, vector<2x256xf32>
    %c0_1 = arith.constant 0 : index
    %c0_2 = arith.constant 0 : index
    %1 = vector.load %arg3[%c0_1, %c0_2] : memref<1x256xf32, #tpu.memory_space<vmem>>, vector<1x256xf32>
    %2 = vector.broadcast %1 : vector<1x256xf32> to vector<2x256xf32>
    %3 = arith.addf %0, %2 : vector<2x256xf32>
    %c0_3 = arith.constant 0 : index
    %c0_4 = arith.constant 0 : index
    %4 = vector.load %arg4[%c0_3, %c0_4] : memref<2x256xf32, #tpu.memory_space<vmem>>, vector<2x256xf32>
    tpu.vector_store %arg4[%c0_3, %c0_4], %3 {strides = array<i32>} : memref<2x256xf32, #tpu.memory_space<vmem>>, vector<2x256xf32>,
    return
  }
  func.func @transform_0(%arg0: i32, %arg1: i32) -> (i32, i32) {
    %c0_i32 = arith.constant 0 : i32
    return %arg1, %arg0 : i32, i32
  }
  func.func @transform_1(%arg0: i32, %arg1: i32) -> (i32, i32) {
    %c0_i32 = arith.constant 0 : i32
    %c0_i32_0 = arith.constant 0 : i32
    return %c0_i32, %arg0 : i32, i32
  }
  func.func @transform_2(%arg0: i32, %arg1: i32) -> (i32, i32) {
    %c0_i32 = arith.constant 0 : i32
    return %arg1, %arg0 : i32, i32
  }
}

</mosaic_0001>

<bundles_post_ra>
// kernel: tpu_custom_call.1
= control target key start
LH: loop header
LB: loop body
LE: loop exit
PB: predicated region body
PF: predicated region fallthrough
CT: control target
= control target key end

     0   :  { %7 = vsyncpa [#allocation3], 0  ;;  %s157_s0 = inlined_call_operand.hbm [shape: f32[2,256], index: 0, kind: input, shape index: {}]   ;;  %s158_s1 = inlined_call_operand.vmem [shape: f32[1,256], index: 1, kind: input, shape index: {}]   ;;  %s159_s2 = inlined_call_operand.hbm [shape: f32[2,256], index: 2, kind: output, shape index: {}]  }
   0x1   :  { %8 = vsyncpa [#allocation4], 0  ;;  %s112_s9 = smov [#allocation2]   ;;  %s64_s13 = scalar_lea.hbm %s157_s0, 64 }
   0x2   :  { %s15_s10 = sshll.u32 %s112_s9, 4  ;;  %p65_p0 = scmp.ne.s32.totalorder %s157_s0, %s64_s13  ;;  %s16_s10 = int_to_ptr.vmem [resolvable:$true] %s15_s10 }
   0x3   :  { %p68_p1 = scmp.lt.u32.totalorder %s64_s13, %s157_s0 }
   0x5   :  { %p70_p2 = pnand %p68_p1, %p65_p0 }
   0x7   :  { %73 = shalt.err (!%p70_p2)
}
   0x8   :  { %s74_s18 = scalar_lea.vmem %s16_s10, 64  ;;  %p79_p4 = scmp.lt.s32.totalorder %s16_s10, %s16_s10 }
   0x9   :  { %p75_p3 = scmp.ne.s32.totalorder %s16_s10, %s74_s18  ;;  %p80_p5 = scmp.lt.s32.totalorder %s74_s18, %s74_s18 }
   0xb   :  { %p81_p6 = por %p80_p5, %p79_p4 }
   0xd   :  { %p82_p7 = pnand %p81_p6, %p75_p3 }
   0xf   :  { %85 = shalt.err (!%p82_p7)
}
  0x10   :  { %18 = dma.hbm_to_vmem [thread:$0]  %s157_s0, 64, %s16_s10, [#allocation3]  }
  0x11   :  { %108 = dma.done.wait [#allocation3], 64  }
  0x12   :  { %109 = vsyncadd [#allocation3], 4294967232  ;;  %v27_v0 = vlaneseq  ;;  %v113_v1 = vmov 1983009808   ;;  %v25_v7 = vld [vmem:[%s158_s1] sm:$0x3] }
  0x13   :  { %v37_v2 = vunpack.c.l.s4 %v113_v1  ;;  %v24_v12 = vld [vmem:[#allocation2] sm:$0xf]  ;;  %s114_s23 = smov [#allocation5]  }
  0x14   :  { %v28_v3 = vshrl.u32 %v27_v0, 7  ;;  %s52_s0 = sshll.u32 %s114_s23, 4  ;;  %s53_s0 = int_to_ptr.vmem [resolvable:$true] %s52_s0 }
  0x15   :  { %v38_v6 = vunpack.c.0.s8 %v37_v2  ;;  %s86_s24 = scalar_lea.vmem %s53_s0, 64  ;;  %p91_p9 = scmp.lt.s32.totalorder %s53_s0, %s53_s0 }
  0x16   :  { %v29_v4 = vsub.s32 0, %v28_v3  ;;  %v33_v5 = vsub.s32 1, %v28_v3  ;;  %p87_p8 = scmp.ne.s32.totalorder %s53_s0, %s86_s24  ;;  %p92_p10 = scmp.lt.s32.totalorder %s86_s24, %s86_s24 }
  0x17   :  { %v41_v10 = vsub.s32 %v38_v6, %v28_v3 }
  0x18   :  { %v30_v8 = vrot.slane %v25_v7, %v29_v4  ;;  %v34_v9 = vrot.slane %v25_v7, %v33_v5  ;;  %p93_p11 = por %p92_p10, %p91_p9 }
  0x1a   :  { %v35_v11 = vcombine.low %v30_v8, %v34_v9  ;;  %p94_p12 = pnand %p93_p11, %p87_p8 }
  0x1c   :  { %v42_v13 = vrot.slane %v35_v11, %v41_v10 }
  0x1e   :  { %v44_v14 = vadd.f32 %v42_v13, %v24_v12 }
  0x20   :  { %45 = vst [vmem:[#allocation5] sm:$0xf] %v44_v14 }
  0x21   :  { %97 = shalt.err (!%p94_p12)
}
  0x22   :  { %s98_s26 = scalar_lea.hbm %s159_s2, 64 }
  0x23   :  { %p99_p13 = scmp.ne.s32.totalorder %s159_s2, %s98_s26  ;;  %p102_p0 = scmp.lt.u32.totalorder %s98_s26, %s159_s2 }
  0x25   :  { %p104_p1 = pnand %p102_p0, %p99_p13 }
  0x27   :  { %107 = shalt.err (!%p104_p1)
}
  0x28   :  { %55 = dma.vmem_to_hbm [thread:$0]  %s53_s0, 64, %s159_s2, [#allocation4]  }
  0x29   :  { %110 = dma.done.wait [#allocation4], 64  }
  0x2a   :  { %111 = vsyncadd [#allocation4], 4294967232 }
  0x2b   :  { %59 = vsyncpa [#allocation3], 1 }
  0x2c   :  { %60 = vsyncpa [#allocation4], 1 }

</bundles_post_ra>
